<compile_context>
chip_gen: v7x
topology: tpu7x:2x2x1
jax: 0.10.0
libtpu: 0.0.40
codegen_flags: <defaults>
</compile_context>

<pallas_src>
import functools

import jax
import jax.numpy as jnp
from jax import lax
from jax.experimental import pallas as pl
from jax.experimental.pallas import tpu as pltpu

# Defaults from the PyTorch module's __init__.
AGE_WEIGHTS = (2.0, 1.0, 1.0, 1.5)
AGE_RANGES = (0.0, 18.0, 40.0, 65.0, 100.0)

# Buckets whose weight differs from the default 1.0 (ranges are disjoint, so
# skipping weight==1.0 buckets is exactly the PyTorch semantics).
_NONUNIT_BUCKETS = tuple(
    (AGE_RANGES[i], AGE_RANGES[i + 1], AGE_WEIGHTS[i])
    for i in range(len(AGE_RANGES) - 1)
    if AGE_WEIGHTS[i] != 1.0
)

LANES = 128
CHUNK_ROWS = 256                          # inner-loop slice: 256x128 f32 = 32 vregs
TILE_BYTES_PER_BLOCK = 4 * 1024 * 1024    # ~4 MiB per input block per buffer
VMEM_LIMIT_BYTES = 32 * 1024 * 1024       # > v5e 16 MiB default, < v7x 64 MiB phys
_SUBLANE_PACK = {4: 8, 2: 16, 1: 32}      # f32 / bf16 / int8-fp8 packed sublane tile


def _round_up(x, m):
    return ((x + m - 1) // m) * m


def _tensorcores_per_device():
    """2 on multi-TensorCore chips (v4 megacore / v7x), else 1."""
    try:
        dev = jax.devices()[0]
        if dev.platform != "tpu":
            return 1
        kind = (getattr(dev, "device_kind", "") or "").lower()
        # TODO(synk): on v7x, verify with xprof that the leading "parallel"
        # axis really shards across both TensorCores; if not, switch to
        # pltpu.CORE_PARALLEL or pl.core_map.
        return 2 if ("v7" in kind or "v4" in kind) else 1
    except Exception:
        return 1


def _wmse_kernel(pred_ref, tgt_ref, out_ref, acc_ref, *,
                 total_rows, tile_rows, chunk_rows):
    """Accumulate sum_i w_i * (p_i - t_i)^2 over this core's row tiles."""
    c = pl.program_id(0)                   # core axis ("parallel")
    i = pl.program_id(1)                   # row-tile reduction axis ("arbitrary")
    tiles_per_core = pl.num_programs(1)

    @pl.when(i == 0)
    def _():
        acc_ref[...] = jnp.zeros_like(acc_ref)

    tile_idx = c * tiles_per_core + i
    tile_start_row = tile_idx * tile_rows
    n_chunks = tile_rows // chunk_rows

    def accumulate_chunk(j, masked):
        off = pl.multiple_of(j * chunk_rows, chunk_rows)
        p = pred_ref[pl.ds(off, chunk_rows), :].astype(jnp.float32)
        t = tgt_ref[pl.ds(off, chunk_rows), :].astype(jnp.float32)

        # Age-range weights (only non-unit buckets; see _NONUNIT_BUCKETS).
        w = jnp.ones_like(t)
        for lo, hi, wt in _NONUNIT_BUCKETS:
            w = jnp.where((t >= jnp.float32(lo)) & (t < jnp.float32(hi)),
                          jnp.float32(wt), w)
        d = p - t
        contrib = w * d * d

        if masked:
            # Row-index validity test.  The kernel only ever sees a
            # 128-aligned element count, so a row is either fully valid or
            # fully invalid — no per-element index, no int32 overflow.
            row = lax.broadcasted_iota(jnp.int32, contrib.shape, 0)
            global_row = tile_start_row + off + row
            contrib = jnp.where(global_row < total_rows, contrib,
                                jnp.float32(0.0))

        # (chunk_rows, 128) -> (8, 128): sublane-group VPU adds only; the
        # single cross-lane reduce happens in the wrapper.
        acc_ref[...] += jnp.sum(
            contrib.reshape(chunk_rows // 8, 8, LANES), axis=0)

    # Interior tiles take the unmasked fast path; only the boundary tile and
    # clamped duplicate tiles pay for the iota/compare/select mask.
    fully_valid = tile_start_row + tile_rows <= total_rows

    @pl.when(fully_valid)
    def _():
        @pl.loop(0, n_chunks)
        def _(j):
            accumulate_chunk(j, masked=False)

    @pl.when(jnp.logical_not(fully_valid))
    def _():
        @pl.loop(0, n_chunks)
        def _(j):
            accumulate_chunk(j, masked=True)

    @pl.when(i == tiles_per_core - 1)
    def _():
        # Lane-dense (8,128) store of this core's partial sums.
        out_ref[0] = acc_ref[...]


def _wmse_partial_sum_pallas(p2d, t2d, tile_rows_max, num_cores):
    """Sum of w*(p-t)^2 over a (rows, 128) pair of arrays via the kernel."""
    rows = p2d.shape[0]
    itemsize = p2d.dtype.itemsize
    sub = _SUBLANE_PACK.get(itemsize, 8)

    if tile_rows_max is None:
        tile_rows_max = TILE_BYTES_PER_BLOCK // (LANES * itemsize)
    tile_rows_max = max(CHUNK_ROWS, (tile_rows_max // CHUNK_ROWS) * CHUNK_ROWS)

    if rows <= CHUNK_ROWS:
        # Small input: one chunk == one tile, rounded to the dtype's packed
        # sublane tile (8 f32 / 16 bf16 / 32 int8).
        tile_rows = _round_up(rows, sub)
        chunk_rows = tile_rows
    else:
        chunk_rows = CHUNK_ROWS
        tile_rows = min(tile_rows_max, _round_up(rows, CHUNK_ROWS))

    num_tiles = pl.cdiv(rows, tile_rows)
    tiles_per_core = pl.cdiv(num_tiles, num_cores)

    def in_map(c, i):
        # Clamp so a block never starts past the end of the array; logical
        # (unclamped) tile indices >= num_tiles are fully masked in-kernel.
        t = c * tiles_per_core + i
        return (jnp.minimum(t, num_tiles - 1), 0)

    kernel = functools.partial(
        _wmse_kernel, total_rows=rows, tile_rows=tile_rows,
        chunk_rows=chunk_rows)

    partials = pl.pallas_call(
        kernel,
        out_shape=jax.ShapeDtypeStruct((num_cores, 8, LANES), jnp.float32),
        grid_spec=pltpu.PrefetchScalarGridSpec(
            num_scalar_prefetch=0,
            grid=(num_cores, tiles_per_core),
            in_specs=[
                pl.BlockSpec((tile_rows, LANES), in_map),
                pl.BlockSpec((tile_rows, LANES), in_map),
            ],
            out_specs=pl.BlockSpec((1, 8, LANES), lambda c, i: (c, 0, 0)),
            scratch_shapes=[pltpu.VMEM((8, LANES), jnp.float32)],
        ),
        compiler_params=pltpu.CompilerParams(
            dimension_semantics=("parallel", "arbitrary"),
            vmem_limit_bytes=VMEM_LIMIT_BYTES,
        ),
        cost_estimate=pl.CostEstimate(
            flops=12 * rows * LANES,
            transcendentals=0,
            bytes_accessed=2 * rows * LANES * itemsize
            + num_cores * 8 * LANES * 4,
        ),
    )(p2d, t2d)

    return jnp.sum(partials)


def _weighted_sq_sum_jax(p, t):
    """Plain-JAX weighted squared-error sum (used only for the <128 tail)."""
    p = p.astype(jnp.float32)
    t = t.astype(jnp.float32)
    w = jnp.ones_like(t)
    for lo, hi, wt in _NONUNIT_BUCKETS:
        w = jnp.where((t >= jnp.float32(lo)) & (t < jnp.float32(hi)),
                      jnp.float32(wt), w)
    d = p - t
    return jnp.sum(w * d * d)


def weighted_mse_loss(predictions, targets, *, tile_rows_max=None,
                      num_cores=None):
    """Pallas implementation of WeightedMSELoss.forward (mean weighted MSE)."""
    pred = jnp.asarray(predictions).reshape(-1)
    tgt = jnp.asarray(targets).reshape(-1)
    assert pred.shape == tgt.shape, (pred.shape, tgt.shape)
    n = pred.shape[0]
    if n == 0:
        # torch.mean of an empty tensor is NaN.
        return jnp.asarray(jnp.nan, jnp.float32)

    if num_cores is None:
        num_cores = _tensorcores_per_device()

    n_main = (n // LANES) * LANES
    total = jnp.float32(0.0)

    if n_main < n:
        # Ragged (<128-element) tail handled in plain JAX instead of paying a
        # full jnp.pad copy of both arrays in the wrapper.
        total = total + _weighted_sq_sum_jax(pred[n_main:], tgt[n_main:])

    if n_main:
        # Contiguous 128-aligned prefix.
        # TODO(synk): verify in HLO that the prefix slice is aliased (not
        # copied); otherwise switch to memory_space=pl.ANY + manual DMA.
        p_main = pred if n_main == n else pred[:n_main]
        t_main = tgt if n_main == n else tgt[:n_main]
        rows = n_main // LANES
        total = total + _wmse_partial_sum_pallas(
            p_main.reshape(rows, LANES), t_main.reshape(rows, LANES),
            tile_rows_max, num_cores)

    return total / jnp.float32(n)


def _reference_loss(predictions, targets):
    """Pure-JAX reference mirroring the PyTorch forward exactly."""
    p = jnp.asarray(predictions, jnp.float32).reshape(-1)
    t = jnp.asarray(targets, jnp.float32).reshape(-1)
    w = jnp.ones_like(t)
    for i in range(len(AGE_RANGES) - 1):
        m = (t >= AGE_RANGES[i]) & (t < AGE_RANGES[i + 1])
        w = jnp.where(m, jnp.float32(AGE_WEIGHTS[i]), w)
    return jnp.mean(w * (p - t) ** 2)


if __name__ == "__main__":
    key = jax.random.PRNGKey(0)
    ks = jax.random.split(key, 10)

    def check(pred, tgt, name, **kwargs):
        got = jax.block_until_ready(weighted_mse_loss(pred, tgt, **kwargs))
        ref = jax.block_until_ready(_reference_loss(pred, tgt))
        assert jnp.allclose(got, ref, rtol=1e-4, atol=1e-4), (name, got, ref)

    # 1) Regression-head style (batch, 1); n=300 is not a multiple of 128 so
    #    this exercises the JAX tail path plus a partial (rows=2 < 8) block.
    t1 = jax.random.uniform(ks[0], (300, 1), jnp.float32, 0.0, 100.0)
    p1 = t1 + jax.random.normal(ks[1], (300, 1), jnp.float32) * 5.0
    check(p1, t1, "case1_ragged_tail")

    # 2) Aligned input on the unmasked fast path (32 full rows).
    t2 = jax.random.uniform(ks[2], (8, 512), jnp.float32, 0.0, 100.0)
    p2 = t2 + jax.random.normal(ks[3], (8, 512), jnp.float32) * 5.0
    check(p2, t2, "case2_fast_path")

    # 3) Multi-chunk tile with a masked boundary (520 rows, default tiling).
    t3 = jax.random.uniform(ks[4], (520, 128), jnp.float32, 0.0, 100.0)
    p3 = t3 + jax.random.normal(ks[5], (520, 128), jnp.float32) * 5.0
    check(p3, t3, "case3_multichunk")

    # 3b) Same data with forced small tiles + a size-2 core axis: exercises
    #     the grid reduction axis, interior fast-path tiles, the masked
    #     boundary tile and a clamped fully-masked duplicate tile.
    check(p3, t3, "case3b_multitile", tile_rows_max=256, num_cores=2)

    # 4) Tiny input (< 128 elements): pure-JAX fallback path.
    t4 = jax.random.uniform(ks[6], (64, 1), jnp.float32, 0.0, 100.0)
    p4 = t4 + jax.random.normal(ks[7], (64, 1), jnp.float32) * 5.0
    check(p4, t4, "case4_tiny")

    # 5) bf16 inputs: checks the (16,128) packed-tile rounding.
    t5 = jax.random.uniform(ks[8], (4, 128), jnp.float32, 0.0, 100.0
                            ).astype(jnp.bfloat16)
    p5 = (t5.astype(jnp.float32)
          + jax.random.normal(ks[9], (4, 128), jnp.float32) * 5.0
          ).astype(jnp.bfloat16)
    check(p5, t5, "case5_bf16")

    print("KERNEL_OK")
</pallas_src>

<mosaic_0001>
module attributes {stable_mosaic.version = 11 : i64} {
  func.func @_wmse_kernel(%arg0: i32, %arg1: i32, %arg2: memref<8x128xf32, #tpu.memory_space<vmem>>, %arg3: memref<8x128xf32, #tpu.memory_space<vmem>>, %arg4: memref<1x8x128xf32, #tpu.memory_space<vmem>>, %arg5: memref<8x128xf32, #tpu.memory_space<vmem>>) attributes {dimension_semantics = [#tpu.dimension_semantics<parallel>, #tpu.dimension_semantics<arbitrary>], iteration_bounds = array<i64: 1, 1>, scalar_prefetch = 0 : i64, scratch_operands = 1 : i64, tpu.core_type = #tpu.core_type<tc>, window_params = [{transform_indices = @transform_0, window_bounds = array<i64: 8, 128>}, {transform_indices = @transform_1, window_bounds = array<i64: 8, 128>}, {transform_indices = @transform_2, window_bounds = array<i64: 1, 8, 128>}]} {
    %c0_i32 = arith.constant 0 : i32
    %0 = arith.cmpi eq, %arg1, %c0_i32 : i32
    %1 = arith.extui %0 : i1 to i32
    %c0_i32_0 = arith.constant 0 : i32
    %2 = arith.cmpi ne, %1, %c0_i32_0 : i32
    scf.if %2 {
      %cst = arith.constant 0.000000e+00 : f32
      %16 = vector.broadcast %cst : f32 to vector<8x128xf32>
      %c0 = arith.constant 0 : index
      %c0_6 = arith.constant 0 : index
      %17 = vector.load %arg5[%c0, %c0_6] : memref<8x128xf32, #tpu.memory_space<vmem>>, vector<8x128xf32>
      tpu.vector_store %arg5[%c0, %c0_6], %16 {strides = array<i32>} : memref<8x128xf32, #tpu.memory_space<vmem>>, vector<8x128xf32>,
    } else {
    }
    %c1_i32 = arith.constant 1 : i32
    %3 = arith.muli %arg0, %c1_i32 : i32
    %4 = arith.addi %3, %arg1 : i32
    %c8_i32 = arith.constant 8 : i32
    %5 = arith.muli %4, %c8_i32 : i32
    %c8_i32_1 = arith.constant 8 : i32
    %6 = arith.addi %5, %c8_i32_1 : i32
    %c2_i32 = arith.constant 2 : i32
    %7 = arith.cmpi sle, %6, %c2_i32 : i32
    %8 = arith.extui %7 : i1 to i32
    %c0_i32_2 = arith.constant 0 : i32
    %9 = arith.cmpi ne, %8, %c0_i32_2 : i32
    scf.if %9 {
      %c0_i32_6 = arith.constant 0 : i32
      %c1_i32_7 = arith.constant 1 : i32
      %16 = arith.muli %c0_i32_6, %c1_i32_7 : i32
      %c0_i32_8 = arith.constant 0 : i32
      %17 = arith.addi %c0_i32_8, %16 : i32
      %c8_i32_9 = arith.constant 8 : i32
      %18 = arith.muli %17, %c8_i32_9 : i32
      %19 = tpu.assume_multiple %18, 8 : i32
      %20 = arith.index_cast %19 : i32 to index
      %c0 = arith.constant 0 : index
      %21 = vector.load %arg2[%20, %c0] : memref<8x128xf32, #tpu.memory_space<vmem>>, vector<8x128xf32>
      %22 = arith.index_cast %19 : i32 to index
      %c0_10 = arith.constant 0 : index
      %23 = vector.load %arg3[%22, %c0_10] : memref<8x128xf32, #tpu.memory_space<vmem>>, vector<8x128xf32>
      %cst = arith.constant 1.000000e+00 : f32
      %24 = vector.broadcast %cst : f32 to vector<8x128xf32>
      %cst_11 = arith.constant 0.000000e+00 : f32
      %25 = vector.broadcast %cst_11 : f32 to vector<8x128xf32>
      %26 = arith.cmpf oge, %23, %25 : vector<8x128xf32>
      %cst_12 = arith.constant 1.800000e+01 : f32
      %27 = vector.broadcast %cst_12 : f32 to vector<8x128xf32>
      %28 = arith.cmpf olt, %23, %27 : vector<8x128xf32>
      %29 = arith.andi %26, %28 : vector<8x128xi1>
      %cst_13 = arith.constant 2.000000e+00 : f32
      %30 = vector.broadcast %cst_13 : f32 to vector<8x128xf32>
      %31 = arith.select %29, %30, %24 : vector<8x128xi1>, vector<8x128xf32>
      %cst_14 = arith.constant 6.500000e+01 : f32
      %32 = vector.broadcast %cst_14 : f32 to vector<8x128xf32>
      %33 = arith.cmpf oge, %23, %32 : vector<8x128xf32>
      %cst_15 = arith.constant 1.000000e+02 : f32
      %34 = vector.broadcast %cst_15 : f32 to vector<8x128xf32>
      %35 = arith.cmpf olt, %23, %34 : vector<8x128xf32>
      %36 = arith.andi %33, %35 : vector<8x128xi1>
      %cst_16 = arith.constant 1.500000e+00 : f32
      %37 = vector.broadcast %cst_16 : f32 to vector<8x128xf32>
      %38 = arith.select %36, %37, %31 : vector<8x128xi1>, vector<8x128xf32>
      %39 = arith.subf %21, %23 : vector<8x128xf32>
      %40 = arith.mulf %38, %39 : vector<8x128xf32>
      %41 = arith.mulf %40, %39 : vector<8x128xf32>
      %c0_17 = arith.constant 0 : index
      %c0_18 = arith.constant 0 : index
      %42 = vector.load %arg5[%c0_17, %c0_18] : memref<8x128xf32, #tpu.memory_space<vmem>>, vector<8x128xf32>
      %43 = vector.shape_cast %41 : vector<8x128xf32> to vector<1x8x128xf32>
      %cst_19 = arith.constant dense<0.000000e+00> : vector<8x128xf32>
      %44 = vector.multi_reduction <add>, %43, %cst_19 [0] : vector<1x8x128xf32> to vector<8x128xf32>
      %45 = arith.addf %42, %44 : vector<8x128xf32>
      %c0_20 = arith.constant 0 : index
      %c0_21 = arith.constant 0 : index
      %46 = vector.load %arg5[%c0_20, %c0_21] : memref<8x128xf32, #tpu.memory_space<vmem>>, vector<8x128xf32>
      tpu.vector_store %arg5[%c0_20, %c0_21], %45 {strides = array<i32>} : memref<8x128xf32, #tpu.memory_space<vmem>>, vector<8x128xf32>,
      %c1_i32_22 = arith.constant 1 : i32
    } else {
    }
    %true = arith.constant true
    %10 = arith.xori %7, %true : i1
    %11 = arith.extui %10 : i1 to i32
    %c0_i32_3 = arith.constant 0 : i32
    %12 = arith.cmpi ne, %11, %c0_i32_3 : i32
    scf.if %12 {
      %c0_i32_6 = arith.constant 0 : i32
      %c1_i32_7 = arith.constant 1 : i32
      %16 = arith.muli %c0_i32_6, %c1_i32_7 : i32
      %c0_i32_8 = arith.constant 0 : i32
      %17 = arith.addi %c0_i32_8, %16 : i32
      %c8_i32_9 = arith.constant 8 : i32
      %18 = arith.muli %17, %c8_i32_9 : i32
      %19 = tpu.assume_multiple %18, 8 : i32
      %20 = arith.index_cast %19 : i32 to index
      %c0 = arith.constant 0 : index
      %21 = vector.load %arg2[%20, %c0] : memref<8x128xf32, #tpu.memory_space<vmem>>, vector<8x128xf32>
      %22 = arith.index_cast %19 : i32 to index
      %c0_10 = arith.constant 0 : index
      %23 = vector.load %arg3[%22, %c0_10] : memref<8x128xf32, #tpu.memory_space<vmem>>, vector<8x128xf32>
      %cst = arith.constant 1.000000e+00 : f32
      %24 = vector.broadcast %cst : f32 to vector<8x128xf32>
      %cst_11 = arith.constant 0.000000e+00 : f32
      %25 = vector.broadcast %cst_11 : f32 to vector<8x128xf32>
      %26 = arith.cmpf oge, %23, %25 : vector<8x128xf32>
      %cst_12 = arith.constant 1.800000e+01 : f32
      %27 = vector.broadcast %cst_12 : f32 to vector<8x128xf32>
      %28 = arith.cmpf olt, %23, %27 : vector<8x128xf32>
      %29 = arith.andi %26, %28 : vector<8x128xi1>
      %cst_13 = arith.constant 2.000000e+00 : f32
      %30 = vector.broadcast %cst_13 : f32 to vector<8x128xf32>
      %31 = arith.select %29, %30, %24 : vector<8x128xi1>, vector<8x128xf32>
      %cst_14 = arith.constant 6.500000e+01 : f32
      %32 = vector.broadcast %cst_14 : f32 to vector<8x128xf32>
      %33 = arith.cmpf oge, %23, %32 : vector<8x128xf32>
      %cst_15 = arith.constant 1.000000e+02 : f32
      %34 = vector.broadcast %cst_15 : f32 to vector<8x128xf32>
      %35 = arith.cmpf olt, %23, %34 : vector<8x128xf32>
      %36 = arith.andi %33, %35 : vector<8x128xi1>
      %cst_16 = arith.constant 1.500000e+00 : f32
      %37 = vector.broadcast %cst_16 : f32 to vector<8x128xf32>
      %38 = arith.select %36, %37, %31 : vector<8x128xi1>, vector<8x128xf32>
      %39 = arith.subf %21, %23 : vector<8x128xf32>
      %40 = arith.mulf %38, %39 : vector<8x128xf32>
      %41 = arith.mulf %40, %39 : vector<8x128xf32>
      %42 = tpu.iota {dimensions = array<i32: 0>} : vector<8x128xi32>
      %43 = arith.addi %5, %19 : i32
      %44 = vector.broadcast %43 : i32 to vector<8x128xi32>
      %45 = arith.addi %44, %42 : vector<8x128xi32>
      %c2_i32_17 = arith.constant 2 : i32
      %46 = vector.broadcast %c2_i32_17 : i32 to vector<8x128xi32>
      %47 = arith.cmpi slt, %45, %46 : vector<8x128xi32>
      %cst_18 = arith.constant 0.000000e+00 : f32
      %48 = vector.broadcast %cst_18 : f32 to vector<8x128xf32>
      %49 = arith.select %47, %41, %48 : vector<8x128xi1>, vector<8x128xf32>
      %c0_19 = arith.constant 0 : index
      %c0_20 = arith.constant 0 : index
      %50 = vector.load %arg5[%c0_19, %c0_20] : memref<8x128xf32, #tpu.memory_space<vmem>>, vector<8x128xf32>
      %51 = vector.shape_cast %49 : vector<8x128xf32> to vector<1x8x128xf32>
      %cst_21 = arith.constant dense<0.000000e+00> : vector<8x128xf32>
      %52 = vector.multi_reduction <add>, %51, %cst_21 [0] : vector<1x8x128xf32> to vector<8x128xf32>
      %53 = arith.addf %50, %52 : vector<8x128xf32>
      %c0_22 = arith.constant 0 : index
      %c0_23 = arith.constant 0 : index
      %54 = vector.load %arg5[%c0_22, %c0_23] : memref<8x128xf32, #tpu.memory_space<vmem>>, vector<8x128xf32>
      tpu.vector_store %arg5[%c0_22, %c0_23], %53 {strides = array<i32>} : memref<8x128xf32, #tpu.memory_space<vmem>>, vector<8x128xf32>,
      %c1_i32_24 = arith.constant 1 : i32
    } else {
    }
    %c0_i32_4 = arith.constant 0 : i32
    %13 = arith.cmpi eq, %arg1, %c0_i32_4 : i32
    %14 = arith.extui %13 : i1 to i32
    %c0_i32_5 = arith.constant 0 : i32
    %15 = arith.cmpi ne, %14, %c0_i32_5 : i32
    scf.if %15 {
      %c0 = arith.constant 0 : index
      %c0_6 = arith.constant 0 : index
      %16 = vector.load %arg5[%c0, %c0_6] : memref<8x128xf32, #tpu.memory_space<vmem>>, vector<8x128xf32>
      %c0_7 = arith.constant 0 : index
      %c0_8 = arith.constant 0 : index
      %c0_9 = arith.constant 0 : index
      %17 = vector.load %arg4[%c0_7, %c0_8, %c0_9] : memref<1x8x128xf32, #tpu.memory_space<vmem>>, vector<1x8x128xf32>
      %18 = vector.shape_cast %17 : vector<1x8x128xf32> to vector<8x128xf32>
      %19 = vector.shape_cast %16 : vector<8x128xf32> to vector<1x8x128xf32>
      tpu.vector_store %arg4[%c0_7, %c0_8, %c0_9], %19 {strides = array<i32>} : memref<1x8x128xf32, #tpu.memory_space<vmem>>, vector<1x8x128xf32>,
    } else {
    }
    return
  }
  func.func @transform_0(%arg0: i32, %arg1: i32) -> (i32, i32) {
    %c1_i32 = arith.constant 1 : i32
    %0 = arith.muli %arg0, %c1_i32 : i32
    %1 = arith.addi %0, %arg1 : i32
    %c0_i32 = arith.constant 0 : i32
    %2 = arith.minsi %1, %c0_i32 : i32
    %c0_i32_0 = arith.constant 0 : i32
    %c0_i32_1 = arith.constant 0 : i32
    return %2, %c0_i32_0 : i32, i32
  }
  func.func @transform_1(%arg0: i32, %arg1: i32) -> (i32, i32) {
    %c1_i32 = arith.constant 1 : i32
    %0 = arith.muli %arg0, %c1_i32 : i32
    %1 = arith.addi %0, %arg1 : i32
    %c0_i32 = arith.constant 0 : i32
    %2 = arith.minsi %1, %c0_i32 : i32
    %c0_i32_0 = arith.constant 0 : i32
    %c0_i32_1 = arith.constant 0 : i32
    return %2, %c0_i32_0 : i32, i32
  }
  func.func @transform_2(%arg0: i32, %arg1: i32) -> (i32, i32, i32) {
    %c0_i32 = arith.constant 0 : i32
    %c0_i32_0 = arith.constant 0 : i32
    %c0_i32_1 = arith.constant 0 : i32
    return %arg0, %c0_i32, %c0_i32_0 : i32, i32, i32
  }
}

</mosaic_0001>

<bundles_post_ra>
// kernel: tpu_custom_call.1
= control target key start
LH: loop header
LB: loop body
LE: loop exit
PB: predicated region body
PF: predicated region fallthrough
CT: control target
= control target key end

     0   :  { %7 = vsyncpa [#allocation4], 0  ;;  %s269_s0 = inlined_call_operand.hbm [shape: f32[2,128], index: 0, kind: input, shape index: {}]   ;;  %s270_s1 = inlined_call_operand.vmem [shape: f32[2,128], index: 1, kind: input, shape index: {}]   ;;  %s271_s2 = inlined_call_operand.hbm [shape: f32[1,8,128], index: 2, kind: output, shape index: {}]  }
   0x1   :  { %8 = vsyncpa [#allocation5], 0 }
   0x2   :  { %19 = vsyncadd [#allocation4], 96  ;;  %s222_s9 = smov [#allocation3]   ;;  %s174_s13 = scalar_lea.hbm %s269_s0, 32 }
   0x3   :  { %s24_s10 = sshll.u32 %s222_s9, 4  ;;  %p175_p0 = scmp.ne.s32.totalorder %s269_s0, %s174_s13  ;;  %s25_s10 = int_to_ptr.vmem [resolvable:$true] %s24_s10 }
   0x4   :  { %p178_p1 = scmp.lt.u32.totalorder %s174_s13, %s269_s0 }
   0x6   :  { %p180_p2 = pnand %p178_p1, %p175_p0 }
   0x8   :  { %183 = shalt.err (!%p180_p2)
}
   0x9   :  { %s184_s18 = scalar_lea.vmem %s25_s10, 32  ;;  %s188_s19 = scalar_lea.vmem %s25_s10, 128 }
   0xa   :  { %p185_p3 = scmp.ne.s32.totalorder %s25_s10, %s184_s18  ;;  %p189_p4 = scmp.lt.s32.totalorder %s25_s10, %s25_s10 }
   0xb   :  { %p190_p5 = scmp.lt.s32.totalorder %s188_s19, %s184_s18 }
   0xd   :  { %p191_p6 = por %p190_p5, %p189_p4 }
   0xf   :  { %p192_p7 = pnand %p191_p6, %p185_p3 }
  0x11   :  { %195 = shalt.err (!%p192_p7)
}
  0x12   :  { %s223_s20 = smov 32   ;;  %s224_s21 = smov 2  }
  0x13   :  { %30 = dma.hbm_to_vmem [thread:$0]  %s269_s0, 32, %s25_s10, [#allocation4], %s223_s20, %s223_s20, %s224_s21  }
  0x14   :  { %218 = dma.done.wait [#allocation4], 128  }
  0x15   :  { %219 = vsyncadd [#allocation4], 4294967168  ;;  %v130_v0 = vlaneseq  ;;  %v117_v1 = vld [vmem:[#allocation3] sm:$0xff]  ;;  %v225_v5 = vmov 1.0   ;;  %s226_s0 = smov [#allocation6]  }
  0x16   :  { %v118_v2 = vld [vmem:[%s270_s1] sm:$0xff]  ;;  %s152_s26 = sshll.u32 %s226_s0, 4  ;;  %s153_s26 = int_to_ptr.vmem [resolvable:$true] %s152_s26 }
  0x17   :  { %vm119_vm0 = vcmp.ge.f32.partialorder %v118_v2, 0.0  ;;  %vm120_vm1 = vcmp.lt.f32.partialorder %v118_v2, 18.0  ;;  %vm123_vm2 = vcmp.ge.f32.partialorder %v118_v2, 65.0  ;;  %vm124_vm3 = vcmp.lt.f32.partialorder %v118_v2, 100.0  ;;  %s196_s1 = scalar_lea.vmem %s153_s26, 128  ;;  %p201_p9 = scmp.lt.s32.totalorder %s153_s26, %s153_s26 }
  0x18   :  { %vm121_vm4 = vmand %vm119_vm0, %vm120_vm1  ;;  %v127_v3 = vsub.f32 %v117_v1, %v118_v2  ;;  %v131_v4 = vshrl.u32 %v130_v0, 7  ;;  %p197_p8 = scmp.ne.s32.totalorder %s153_s26, %s196_s1  ;;  %p202_p10 = scmp.lt.s32.totalorder %s196_s1, %s196_s1 }
  0x19   :  { %v122_v6 = vsel %vm121_vm4, 2.0, %v225_v5  ;;  %vm125_vm5 = vmand %vm123_vm2, %vm124_vm3 }
  0x1a   :  { %v126_v7 = vsel %vm125_vm5, 1.5, %v122_v6  ;;  %vm135_vm6 = vcmp.lt.s32.totalorder %v131_v4, 2  ;;  %p203_p11 = por %p202_p10, %p201_p9 }
  0x1b   :  { %v128_v8 = vmul.f32 %v127_v3, %v126_v7 }
  0x1c   :  { %p204_p12 = pnand %p203_p11, %p197_p8 }
  0x1d   :  { %v129_v9 = vmul.f32 %v128_v8, %v127_v3 }
  0x1f   :  { %v136_v10 = vsel %vm135_vm6, %v129_v9, 0.0 }
  0x20   :  { %145 = vst [vmem:[#allocation6] sm:$0xff] %v136_v10 }
  0x21   :  { %207 = shalt.err (!%p204_p12)
}
  0x22   :  { %s208_s29 = scalar_lea.hbm %s271_s2, 128 }
  0x23   :  { %p209_p13 = scmp.ne.s32.totalorder %s271_s2, %s208_s29  ;;  %p212_p0 = scmp.lt.u32.totalorder %s208_s29, %s271_s2 }
  0x25   :  { %p214_p1 = pnand %p212_p0, %p209_p13 }
  0x27   :  { %217 = shalt.err (!%p214_p1)
}
  0x28   :  { %155 = dma.vmem_to_hbm [thread:$0]  %s153_s26, 128, %s271_s2, [#allocation5]  }
  0x29   :  { %220 = dma.done.wait [#allocation5], 128  }
  0x2a   :  { %221 = vsyncadd [#allocation5], 4294967168 }
  0x2b   :  { %159 = vsyncpa [#allocation4], 1 }
  0x2c   :  { %160 = vsyncpa [#allocation5], 1 }

</bundles_post_ra>
